<compile_context>
chip_gen: v5e
topology: v5e:2x2
jax: 0.10.0
libtpu: 0.0.40
codegen_flags: <defaults>
</compile_context>

<pallas_src>
import functools

import jax
import jax.numpy as jnp
from jax.experimental import pallas as pl
from jax.experimental.pallas import tpu as pltpu


def _dwconv_bn_kernel(x_ref, w_ref, mask_ref, o_ref, *, img_h, img_w, kh, kw, pad,
                      chunk_rows, num_chunks, unroll):
    # x_ref:    (RB, H*W)     RB independent (batch, channel) images, pixels on lanes
    # w_ref:    (RB, KT+1)    per-row depthwise weights (BN scale folded), last col = shift
    # mask_ref: (KT, H*W)     per-tap border masks (replace zero padding), x dtype
    # o_ref:    (RB, H*W)
    hw = img_h * img_w
    kt = kh * kw
    t0 = pad * kw + pad                       # zero-offset tap: no roll, no mask
    masks = mask_ref[...]                     # tiny, hoisted out of the chunk loop

    def do_chunk(r0):
        x = x_ref[pl.ds(r0, chunk_rows), :]                            # keep input dtype
        wc = w_ref[pl.ds(r0, chunk_rows), :].astype(jnp.float32)       # (CR, KT+1)
        # init acc from the zero-offset tap + folded BN/bias shift (no zeros splat,
        # no separate epilogue add).
        acc = x.astype(jnp.float32) * wc[:, t0:t0 + 1] + wc[:, kt:kt + 1]
        for ki in range(kh):
            for kj in range(kw):
                t = ki * kw + kj
                if t == t0:
                    continue
                s = (ki - pad) * img_w + (kj - pad)                    # flat tap offset
                # out[p] needs x[p + s] -> roll by -s (XLU rotation, no slices)
                rolled = pltpu.roll(x, shift=(-s) % hw, axis=1)
                masked = rolled * masks[t:t + 1, :]                    # narrow-dtype mask
                acc = acc + masked.astype(jnp.float32) * wc[:, t:t + 1]
        o_ref[pl.ds(r0, chunk_rows), :] = acc.astype(o_ref.dtype)

    if num_chunks == 1:
        do_chunk(0)
    else:
        def body(ci, carry):
            do_chunk(pl.multiple_of(ci * chunk_rows, chunk_rows))
            return carry
        jax.lax.fori_loop(0, num_chunks, body, None, unroll=unroll)


def depthwise_conv2d_bn(x_nchw, weight, conv_bias, gamma, beta, run_mean, run_var,
                        *, padding=1, eps=1e-5):
    """Depthwise Conv2d(groups=C, stride=1, symmetric padding) + BatchNorm2d (eval stats).

    NCHW in / NCHW out, matching the PyTorch module in eval mode.
    """
    n, c, h, w = x_nchw.shape
    c_out, cin_per_group, kh, kw = weight.shape
    assert c_out == c and cin_per_group == 1, "depthwise: weight must be (C, 1, KH, KW)"
    oh = h + 2 * padding - kh + 1
    ow = w + 2 * padding - kw + 1
    # stride=1, symmetric padding, kernel >= 2*pad+1 supported.
    assert 0 < oh <= h and 0 < ow <= w, "only stride=1 with kernel >= 2*padding+1 supported"
    # TODO(synk): stride>1 / asymmetric padding / BatchNorm training-mode batch stats
    # are not implemented; eval-mode running stats are folded into scale/shift.

    hw = h * w
    nc = n * c
    kt = kh * kw

    # Lane-density guard: rolls/stores need the flat pixel axis lane-dense.
    assert hw % 128 == 0, "H*W must be a multiple of 128"
    # TODO(synk): add a lane-padded layout path for H*W not a multiple of 128 (e.g. 14x14).

    # ---- fold BN (eval) + conv bias into per-channel weight scale & shift column ----
    scale = (gamma / jnp.sqrt(run_var + eps)).astype(jnp.float32)            # (C,)
    shift = (beta + (conv_bias - run_mean) * scale).astype(jnp.float32)      # (C,)
    w_scaled = (weight[:, 0, :, :].astype(jnp.float32)
                * scale[:, None, None]).reshape(c, kt)                       # (C, KT)
    w_chan = jnp.concatenate([w_scaled, shift[:, None]], axis=1)             # (C, KT+1)

    # ---- per-tap border masks (replace wrapper-side zero padding) ----
    ys = jnp.arange(h, dtype=jnp.int32)[:, None]
    xs = jnp.arange(w, dtype=jnp.int32)[None, :]
    mask_rows = []
    for ki in range(kh):
        for kj in range(kw):
            di, dj = ki - padding, kj - padding
            valid = ((ys + di >= 0) & (ys + di < h) & (xs + dj >= 0) & (xs + dj < w))
            mask_rows.append(valid.reshape(hw))
    masks = jnp.stack(mask_rows, axis=0).astype(x_nchw.dtype)                # (KT, H*W)

    # ---- flatten to rows of independent depthwise images (free reshape) ----
    x_rows = x_nchw.reshape(nc, hw)

    itemsize = x_nchw.dtype.itemsize
    row_bytes = hw * itemsize
    row_align = 16 if itemsize == 2 else 8          # bf16 prefers sublane multiple of 16

    # ---- generation-gated block budget: v7x has 64 MiB VMEM/TC, v5e/v6e 128 MiB ----
    try:
        vmem_cap = int(pltpu.get_tpu_info().vmem_capacity_bytes)
    except Exception:
        vmem_cap = 64 << 20                         # conservative fallback (v7x per-TC)
    x_block_budget = (4 << 20) if vmem_cap <= (64 << 20) else (8 << 20)

    rb = max(row_align, (x_block_budget // row_bytes) // row_align * row_align)
    rb = min(rb, ((nc + row_align - 1) // row_align) * row_align)
    # keep >= 2 grid steps when possible so v7x's two TensorCores both get row blocks
    if rb >= nc and nc > row_align:
        half = (nc + 1) // 2
        rb = ((half + row_align - 1) // row_align) * row_align
    nc_pad = pl.cdiv(nc, rb) * rb

    if nc_pad != nc:
        x_rows = jnp.pad(x_rows, ((0, nc_pad - nc), (0, 0)))

    # ---- weights: resident constant block when rb % C == 0, else tiled stream ----
    if rb % c == 0:
        w_rows = jnp.tile(w_chan, (rb // c, 1))                              # (rb, KT+1)
        w_spec = pl.BlockSpec((rb, kt + 1), lambda r: (0, 0))
    else:
        w_rows = jnp.tile(w_chan, (n, 1))                                    # (N*C, KT+1)
        if nc_pad != nc:
            w_rows = jnp.pad(w_rows, ((0, nc_pad - nc), (0, 0)))
        w_spec = pl.BlockSpec((rb, kt + 1), lambda r: (r, 0))

    # ---- in-kernel sublane chunking (keep per-chunk tap chain in vregs) ----
    cr = row_align
    while cr * 2 <= rb and rb % (cr * 2) == 0 and (cr * 2) * hw * 4 <= (32 << 10):
        cr *= 2
    num_chunks = rb // cr

    kernel = functools.partial(
        _dwconv_bn_kernel, img_h=h, img_w=w, kh=kh, kw=kw, pad=padding,
        chunk_rows=cr, num_chunks=num_chunks, unroll=(num_chunks <= 4))

    block_bytes = rb * row_bytes
    vmem_limit = 4 * block_bytes + (8 << 20)        # 2x in + 2x out double buffers + headroom
    vmem_limit = int(max(32 << 20, min(vmem_limit, vmem_cap - (8 << 20))))

    out_rows = pl.pallas_call(
        kernel,
        out_shape=jax.ShapeDtypeStruct((nc_pad, hw), x_nchw.dtype),
        grid_spec=pltpu.PrefetchScalarGridSpec(
            num_scalar_prefetch=0,
            grid=(nc_pad // rb,),
            in_specs=[
                pl.BlockSpec((rb, hw), lambda r: (r, 0)),
                w_spec,
                pl.BlockSpec((kt, hw), lambda r: (0, 0)),
            ],
            out_specs=pl.BlockSpec((rb, hw), lambda r: (r, 0)),
        ),
        compiler_params=pltpu.CompilerParams(
            dimension_semantics=("parallel",),
            vmem_limit_bytes=vmem_limit),
    )(x_rows, w_rows, masks)

    out = out_rows[:nc].reshape(n, c, h, w)
    if oh != h or ow != w:
        out = out[:, :, :oh, :ow]
    return out


def _reference(x, weight, conv_bias, gamma, beta, run_mean, run_var, padding=1, eps=1e-5):
    # pure-JAX reference (lax conv with feature_group_count = C)
    c = x.shape[1]
    y = jax.lax.conv_general_dilated(
        x, weight, window_strides=(1, 1),
        padding=[(padding, padding), (padding, padding)],
        dimension_numbers=("NCHW", "OIHW", "NCHW"),
        feature_group_count=c)
    y = y + conv_bias.reshape(1, c, 1, 1)
    s = gamma / jnp.sqrt(run_var + eps)
    return (y - run_mean.reshape(1, c, 1, 1)) * s.reshape(1, c, 1, 1) + beta.reshape(1, c, 1, 1)


if __name__ == "__main__":
    key = jax.random.PRNGKey(0)
    k1, k2, k3, k4, k5, k6, k7 = jax.random.split(key, 7)

    N, C, H, W = 2, 4, 16, 16
    KH = KW = 3
    PAD = 1

    x = jax.random.normal(k1, (N, C, H, W), jnp.float32)
    weight = jax.random.normal(k2, (C, 1, KH, KW), jnp.float32) * 0.1   # (C_out, 1, KH, KW)
    conv_bias = jax.random.normal(k3, (C,), jnp.float32) * 0.1
    gamma = 1.0 + 0.1 * jax.random.normal(k4, (C,), jnp.float32)
    beta = 0.1 * jax.random.normal(k5, (C,), jnp.float32)
    run_mean = 0.1 * jax.random.normal(k6, (C,), jnp.float32)
    run_var = jnp.abs(1.0 + 0.1 * jax.random.normal(k7, (C,), jnp.float32))

    out = depthwise_conv2d_bn(x, weight, conv_bias, gamma, beta, run_mean, run_var,
                              padding=PAD)
    out = jax.block_until_ready(out)

    ref = _reference(x, weight, conv_bias, gamma, beta, run_mean, run_var, padding=PAD)
    assert out.shape == (N, C, H, W), out.shape
    assert jnp.allclose(out, ref, atol=1e-4, rtol=1e-4), float(jnp.max(jnp.abs(out - ref)))

    print("KERNEL_OK")
</pallas_src>

<mosaic_0001>
module attributes {stable_mosaic.version = 11 : i64} {
  func.func @_dwconv_bn_kernel(%arg0: i32, %arg1: memref<8x256xf32, #tpu.memory_space<vmem>>, %arg2: memref<8x10xf32, #tpu.memory_space<vmem>>, %arg3: memref<9x256xf32, #tpu.memory_space<vmem>>, %arg4: memref<8x256xf32, #tpu.memory_space<vmem>>) attributes {dimension_semantics = [#tpu.dimension_semantics<parallel>], iteration_bounds = array<i64: 1>, scalar_prefetch = 0 : i64, scratch_operands = 0 : i64, tpu.core_type = #tpu.core_type<tc>, window_params = [{transform_indices = @transform_0, window_bounds = array<i64: 8, 256>}, {pipeline_mode = #tpu.pipeline_mode<synchronous>, transform_indices = @transform_1, window_bounds = array<i64: 8, 10>}, {pipeline_mode = #tpu.pipeline_mode<synchronous>, transform_indices = @transform_2, window_bounds = array<i64: 9, 256>}, {transform_indices = @transform_3, window_bounds = array<i64: 8, 256>}]} {
    %c0 = arith.constant 0 : index
    %c0_0 = arith.constant 0 : index
    %0 = vector.load %arg3[%c0, %c0_0] : memref<9x256xf32, #tpu.memory_space<vmem>>, vector<9x256xf32>
    %c0_1 = arith.constant 0 : index
    %c0_2 = arith.constant 0 : index
    %1 = vector.load %arg1[%c0_1, %c0_2] : memref<8x256xf32, #tpu.memory_space<vmem>>, vector<8x256xf32>
    %c0_3 = arith.constant 0 : index
    %c0_4 = arith.constant 0 : index
    %2 = vector.load %arg2[%c0_3, %c0_4] : memref<8x10xf32, #tpu.memory_space<vmem>>, vector<8x10xf32>
    %3 = vector.extract_strided_slice %2 {offsets = [0, 4], sizes = [8, 1], strides = [1, 1]} : vector<8x10xf32> to vector<8x1xf32>
    %4 = vector.broadcast %3 : vector<8x1xf32> to vector<8x256xf32>
    %5 = arith.mulf %1, %4 : vector<8x256xf32>
    %6 = vector.extract_strided_slice %2 {offsets = [0, 9], sizes = [8, 1], strides = [1, 1]} : vector<8x10xf32> to vector<8x1xf32>
    %7 = vector.broadcast %6 : vector<8x1xf32> to vector<8x256xf32>
    %8 = arith.addf %5, %7 : vector<8x256xf32>
    %c17_i32 = arith.constant 17 : i32
    %9 = tpu.dynamic_rotate %1 by %c17_i32 dim 1 : vector<8x256xf32>, i32 -> vector<8x256xf32>
    %10 = vector.extract_strided_slice %0 {offsets = [0, 0], sizes = [1, 256], strides = [1, 1]} : vector<9x256xf32> to vector<1x256xf32>
    %11 = vector.broadcast %10 : vector<1x256xf32> to vector<8x256xf32>
    %12 = arith.mulf %9, %11 : vector<8x256xf32>
    %13 = vector.extract_strided_slice %2 {offsets = [0, 0], sizes = [8, 1], strides = [1, 1]} : vector<8x10xf32> to vector<8x1xf32>
    %14 = vector.broadcast %13 : vector<8x1xf32> to vector<8x256xf32>
    %15 = arith.mulf %12, %14 : vector<8x256xf32>
    %16 = arith.addf %8, %15 : vector<8x256xf32>
    %c16_i32 = arith.constant 16 : i32
    %17 = tpu.dynamic_rotate %1 by %c16_i32 dim 1 : vector<8x256xf32>, i32 -> vector<8x256xf32>
    %18 = vector.extract_strided_slice %0 {offsets = [1, 0], sizes = [1, 256], strides = [1, 1]} : vector<9x256xf32> to vector<1x256xf32>
    %19 = vector.broadcast %18 : vector<1x256xf32> to vector<8x256xf32>
    %20 = arith.mulf %17, %19 : vector<8x256xf32>
    %21 = vector.extract_strided_slice %2 {offsets = [0, 1], sizes = [8, 1], strides = [1, 1]} : vector<8x10xf32> to vector<8x1xf32>
    %22 = vector.broadcast %21 : vector<8x1xf32> to vector<8x256xf32>
    %23 = arith.mulf %20, %22 : vector<8x256xf32>
    %24 = arith.addf %16, %23 : vector<8x256xf32>
    %c15_i32 = arith.constant 15 : i32
    %25 = tpu.dynamic_rotate %1 by %c15_i32 dim 1 : vector<8x256xf32>, i32 -> vector<8x256xf32>
    %26 = vector.extract_strided_slice %0 {offsets = [2, 0], sizes = [1, 256], strides = [1, 1]} : vector<9x256xf32> to vector<1x256xf32>
    %27 = vector.broadcast %26 : vector<1x256xf32> to vector<8x256xf32>
    %28 = arith.mulf %25, %27 : vector<8x256xf32>
    %29 = vector.extract_strided_slice %2 {offsets = [0, 2], sizes = [8, 1], strides = [1, 1]} : vector<8x10xf32> to vector<8x1xf32>
    %30 = vector.broadcast %29 : vector<8x1xf32> to vector<8x256xf32>
    %31 = arith.mulf %28, %30 : vector<8x256xf32>
    %32 = arith.addf %24, %31 : vector<8x256xf32>
    %c1_i32 = arith.constant 1 : i32
    %33 = tpu.dynamic_rotate %1 by %c1_i32 dim 1 : vector<8x256xf32>, i32 -> vector<8x256xf32>
    %34 = vector.extract_strided_slice %0 {offsets = [3, 0], sizes = [1, 256], strides = [1, 1]} : vector<9x256xf32> to vector<1x256xf32>
    %35 = vector.broadcast %34 : vector<1x256xf32> to vector<8x256xf32>
    %36 = arith.mulf %33, %35 : vector<8x256xf32>
    %37 = vector.extract_strided_slice %2 {offsets = [0, 3], sizes = [8, 1], strides = [1, 1]} : vector<8x10xf32> to vector<8x1xf32>
    %38 = vector.broadcast %37 : vector<8x1xf32> to vector<8x256xf32>
    %39 = arith.mulf %36, %38 : vector<8x256xf32>
    %40 = arith.addf %32, %39 : vector<8x256xf32>
    %c255_i32 = arith.constant 255 : i32
    %41 = tpu.dynamic_rotate %1 by %c255_i32 dim 1 : vector<8x256xf32>, i32 -> vector<8x256xf32>
    %42 = vector.extract_strided_slice %0 {offsets = [5, 0], sizes = [1, 256], strides = [1, 1]} : vector<9x256xf32> to vector<1x256xf32>
    %43 = vector.broadcast %42 : vector<1x256xf32> to vector<8x256xf32>
    %44 = arith.mulf %41, %43 : vector<8x256xf32>
    %45 = vector.extract_strided_slice %2 {offsets = [0, 5], sizes = [8, 1], strides = [1, 1]} : vector<8x10xf32> to vector<8x1xf32>
    %46 = vector.broadcast %45 : vector<8x1xf32> to vector<8x256xf32>
    %47 = arith.mulf %44, %46 : vector<8x256xf32>
    %48 = arith.addf %40, %47 : vector<8x256xf32>
    %c241_i32 = arith.constant 241 : i32
    %49 = tpu.dynamic_rotate %1 by %c241_i32 dim 1 : vector<8x256xf32>, i32 -> vector<8x256xf32>
    %50 = vector.extract_strided_slice %0 {offsets = [6, 0], sizes = [1, 256], strides = [1, 1]} : vector<9x256xf32> to vector<1x256xf32>
    %51 = vector.broadcast %50 : vector<1x256xf32> to vector<8x256xf32>
    %52 = arith.mulf %49, %51 : vector<8x256xf32>
    %53 = vector.extract_strided_slice %2 {offsets = [0, 6], sizes = [8, 1], strides = [1, 1]} : vector<8x10xf32> to vector<8x1xf32>
    %54 = vector.broadcast %53 : vector<8x1xf32> to vector<8x256xf32>
    %55 = arith.mulf %52, %54 : vector<8x256xf32>
    %56 = arith.addf %48, %55 : vector<8x256xf32>
    %c240_i32 = arith.constant 240 : i32
    %57 = tpu.dynamic_rotate %1 by %c240_i32 dim 1 : vector<8x256xf32>, i32 -> vector<8x256xf32>
    %58 = vector.extract_strided_slice %0 {offsets = [7, 0], sizes = [1, 256], strides = [1, 1]} : vector<9x256xf32> to vector<1x256xf32>
    %59 = vector.broadcast %58 : vector<1x256xf32> to vector<8x256xf32>
    %60 = arith.mulf %57, %59 : vector<8x256xf32>
    %61 = vector.extract_strided_slice %2 {offsets = [0, 7], sizes = [8, 1], strides = [1, 1]} : vector<8x10xf32> to vector<8x1xf32>
    %62 = vector.broadcast %61 : vector<8x1xf32> to vector<8x256xf32>
    %63 = arith.mulf %60, %62 : vector<8x256xf32>
    %64 = arith.addf %56, %63 : vector<8x256xf32>
    %c239_i32 = arith.constant 239 : i32
    %65 = tpu.dynamic_rotate %1 by %c239_i32 dim 1 : vector<8x256xf32>, i32 -> vector<8x256xf32>
    %66 = vector.extract_strided_slice %0 {offsets = [8, 0], sizes = [1, 256], strides = [1, 1]} : vector<9x256xf32> to vector<1x256xf32>
    %67 = vector.broadcast %66 : vector<1x256xf32> to vector<8x256xf32>
    %68 = arith.mulf %65, %67 : vector<8x256xf32>
    %69 = vector.extract_strided_slice %2 {offsets = [0, 8], sizes = [8, 1], strides = [1, 1]} : vector<8x10xf32> to vector<8x1xf32>
    %70 = vector.broadcast %69 : vector<8x1xf32> to vector<8x256xf32>
    %71 = arith.mulf %68, %70 : vector<8x256xf32>
    %72 = arith.addf %64, %71 : vector<8x256xf32>
    %c0_5 = arith.constant 0 : index
    %c0_6 = arith.constant 0 : index
    %73 = vector.load %arg4[%c0_5, %c0_6] : memref<8x256xf32, #tpu.memory_space<vmem>>, vector<8x256xf32>
    tpu.vector_store %arg4[%c0_5, %c0_6], %72 {strides = array<i32>} : memref<8x256xf32, #tpu.memory_space<vmem>>, vector<8x256xf32>,
    return
  }
  func.func @transform_0(%arg0: i32) -> (i32, i32) {
    %c0_i32 = arith.constant 0 : i32
    %c0_i32_0 = arith.constant 0 : i32
    return %arg0, %c0_i32 : i32, i32
  }
  func.func @transform_1(%arg0: i32) -> (i32, i32) {
    %c0_i32 = arith.constant 0 : i32
    %c0_i32_0 = arith.constant 0 : i32
    %c0_i32_1 = arith.constant 0 : i32
    return %c0_i32, %c0_i32_0 : i32, i32
  }
  func.func @transform_2(%arg0: i32) -> (i32, i32) {
    %c0_i32 = arith.constant 0 : i32
    %c0_i32_0 = arith.constant 0 : i32
    %c0_i32_1 = arith.constant 0 : i32
    return %c0_i32, %c0_i32_0 : i32, i32
  }
  func.func @transform_3(%arg0: i32) -> (i32, i32) {
    %c0_i32 = arith.constant 0 : i32
    %c0_i32_0 = arith.constant 0 : i32
    return %arg0, %c0_i32 : i32, i32
  }
}

</mosaic_0001>

<bundles_post_ra>
// kernel: tpu_custom_call.1
= control target key start
LH: loop header
LB: loop body
LE: loop exit
PB: predicated region body
PF: predicated region fallthrough
CT: control target
= control target key end

     0   :  { %8 = vsyncpa [#allocation3], 0  ;;  %s511_s0 = inlined_call_operand.hbm [shape: f32[8,256], index: 0, kind: input, shape index: {}]   ;;  %s512_s1 = inlined_call_operand.hbm [shape: f32[8,10], index: 1, kind: input, shape index: {}]   ;;  %s513_s2 = inlined_call_operand.hbm [shape: f32[9,256], index: 2, kind: input, shape index: {}]   ;;  %s514_s3 = inlined_call_operand.hbm [shape: f32[8,256], index: 3, kind: output, shape index: {}]  }
   0x1   :  { %9 = vsyncpa [#allocation6], 0  ;;  %s27_s14 = sshll.u32 %s512_s1, 4  ;;  %s28_s14 = int_to_ptr.hbm [resolvable:$true] %s27_s14 }
   0x2   :  { %10 = vsyncpa [#allocation4], 0  ;;  %s390_s15 = smov [#allocation5]   ;;  %s16_s19 = sshll.u32 %s511_s0, 4  ;;  %s17_s19 = int_to_ptr.hbm [resolvable:$true] %s16_s19 }
   0x3   :  { %s29_s16 = sshll.u32 %s390_s15, 4  ;;  %s391_s20 = smov [#allocation2]   ;;  %s30_s16 = int_to_ptr.vmem [resolvable:$true] %s29_s16 }
   0x4   :  { %32 = dma.hbm_to_vmem [thread:$0]  %s28_s14, 128, %s30_s16, [#allocation6]  }
   0x5   :  { %s18_s21 = sshll.u32 %s391_s20, 4  ;;  %s37_s24 = sshll.u32 %s513_s2, 4  ;;  %s19_s21 = int_to_ptr.vmem [resolvable:$true] %s18_s21  ;;  %s38_s24 = int_to_ptr.hbm [resolvable:$true] %s37_s24 }
   0x6   :  { %21 = dma.hbm_to_vmem [thread:$0]  %s17_s19, 256, %s19_s21, [#allocation3]  }
   0x7   :  { %s392_s1 = smov [#allocation7]   ;;  %s393_s26 = smov 256  }
   0x8   :  { %s39_s25 = sshll.u32 %s392_s1, 4  ;;  %s394_s27 = smov 16   ;;  %s40_s25 = int_to_ptr.vmem [resolvable:$true] %s39_s25 }
   0x9   :  { %45 = dma.hbm_to_vmem [thread:$0]  %s38_s24, 512, %s40_s25, [#allocation6], %s393_s26, %s393_s26, %s394_s27  }
   0xa   :  { %384 = dma.done.wait [#allocation3], 256  }
   0xb   :  { %385 = vsyncadd [#allocation3], 4294967040 }
   0xc   :  { %386 = dma.done.wait [#allocation6], 640  }
   0xd   :  { %387 = vsyncadd [#allocation6], 4294966656  ;;  %v395_v0 = vmov 4   ;;  %v396_v1 = vmov 0   ;;  %v442_v2 = vld [vmem:[#allocation2] sm:$0xff]  ;;  %v64_v3 = vld [vmem:[#allocation5] sm:$0xff]  ;;  %v82_v26 = vlaneseq }
   0xe   :  { %275 = vset.pattern.permute.xlu0 %v395_v0  ;;  %277 = vset.pattern.permute.xlu2 %v396_v1  ;;  %s397_s0 = smov 17   ;;  %v445_v4 = vld [vmem:[#allocation2 + $0x8] sm:$0xff]  ;;  %v398_v5 = vmov 9   ;;  %v399_v6 = vmov 1   ;;  %v400_v7 = vmov 5   ;;  %s401_s2 = smov 15  }
   0xf   :  { %78 = vrot.lane.b32.xlu1 %v442_v2, %s397_s0  ;;  %67 = vperm.xlu0 %275, %v64_v3   ;;  %s402_s28 = smov 1   ;;  %v403_v8 = vmov 2   ;;  %s404_s29 = smov 127   ;;  %v405_v9 = vmov 3   ;;  %v406_v10 = vmov 8   ;;  %v409_v11 = vmov 6  }
  0x10   :  { %92 = vperm.xlu2 %277, %v64_v3   ;;  %281 = vset.pattern.permute.xlu1 %v400_v7  ;;  %s407_s30 = smov 113   ;;  %s408_s4 = smov 112   ;;  %v411_v12 = vmov 7   ;;  %v464_v29 = vand.u32 127, %v82_v26  ;;  %v468_v31 = vld [vmem:[#allocation7] sm:$0xff]  ;;  %v470_v32 = vld [vmem:[#allocation7 + $0x8] sm:$0xff] }
  0x11   :  { %s410_s5 = smov 111   ;;  %v87_v35 = vperm.slane %v468_v31, 0  ;;  %v88_v36 = vperm.slane %v470_v32, 0  ;;  %v106_v39 = vperm.slane %v468_v31, 1  ;;  %v107_v42 = vperm.slane %v470_v32, 1  ;;  %s412_s6 = smov [#allocation8]  }
  0x12   :  { %vm84_vm0 = vcmp.lt.s32.totalorder %v464_v29, 17  ;;  %vm103_vm1 = vcmp.lt.s32.totalorder %v464_v29, 16  ;;  %vm122_vm2 = vcmp.lt.s32.totalorder %v464_v29, 15  ;;  %v125_v48 = vperm.slane %v468_v31, 2  ;;  %s239_s7 = sshll.u32 %s412_s6, 4  ;;  %s241_s10 = sshll.u32 %s514_s3, 4  ;;  %s240_s7 = int_to_ptr.vmem [resolvable:$true] %s239_s7  ;;  %s242_s10 = int_to_ptr.hbm [resolvable:$true] %s241_s10 }
  0x13   :  { %v126_v49 = vperm.slane %v470_v32, 2  ;;  %vm141_vm3 = vcmp.lt.s32.totalorder %v464_v29, 1  ;;  %v144_v52 = vperm.slane %v468_v31, 3  ;;  %v145_v53 = vperm.slane %v470_v32, 3 }
  0x14   :  { %vm160_vm4 = vcmp.lt.s32.totalorder %v464_v29, 127  ;;  %vm179_vm5 = vcmp.lt.s32.totalorder %v464_v29, 113  ;;  %vm198_vm6 = vcmp.lt.s32.totalorder %v464_v29, 112  ;;  %vm217_vm7 = vcmp.lt.s32.totalorder %v464_v29, 111 }
  0x17   :  { %80 = vrot.lane.b32.xlu1 %v445_v4, %s397_s0  ;;  %276 = vset.pattern.permute.xlu0 %v398_v5 }
  0x18   :  { %73 = vperm.xlu0 %276, %v64_v3   ;;  %99 = vrot.lane.b32.xlu2 %v442_v2, %s394_s27 }
  0x19   :  { %278 = vset.pattern.permute.xlu2 %v399_v6 }
  0x1f   :  { %101 = vrot.lane.b32.xlu1 %v445_v4, %s394_s27 }
  0x20   :  { %118 = vrot.lane.b32.xlu0 %v442_v2, %s401_s2  ;;  %111 = vperm.xlu2 %278, %v64_v3  }
  0x21   :  { %285 = vset.pattern.permute.xlu0 %v406_v10 }
  0x27   :  { %120 = vrot.lane.b32.xlu1 %v445_v4, %s401_s2 }
  0x28   :  { %137 = vrot.lane.b32.xlu0 %v442_v2, %s402_s28  ;;  %279 = vset.pattern.permute.xlu2 %v403_v8 }
  0x29   :  { %130 = vperm.xlu2 %279, %v64_v3  }
  0x2f   :  { %139 = vrot.lane.b32.xlu1 %v445_v4, %s402_s28 }
  0x30   :  { %156 = vrot.lane.b32.xlu0 %v442_v2, %s404_s29 }
  0x31   :  { %280 = vset.pattern.permute.xlu2 %v405_v9  ;;  %v164_v9 = vperm.slane %v470_v32, 5 }
  0x32   :  { %149 = vperm.xlu2 %280, %v64_v3  }
  0x37   :  { %158 = vrot.lane.b32.xlu1 %v445_v4, %s404_s29 }
  0x38   :  { %177 = vrot.lane.b32.xlu0 %v445_v4, %s407_s30 }
  0x3a   :  { %175 = vrot.lane.b32.xlu2 %v442_v2, %s407_s30 }
  0x3b   :  { %284 = vset.pattern.permute.xlu2 %v406_v10 }
  0x3f   :  { %168 = vperm.xlu1 %281, %v64_v3  }
  0x40   :  { %196 = vrot.lane.b32.xlu0 %v445_v4, %s408_s4 }
  0x42   :  { %194 = vrot.lane.b32.xlu2 %v442_v2, %s408_s4 }
  0x47   :  { %282 = vset.pattern.permute.xlu1 %v409_v11 }
  0x48   :  { %187 = vperm.xlu1 %282, %v64_v3   ;;  %215 = vrot.lane.b32.xlu0 %v445_v4, %s410_s5 }
  0x4a   :  { %213 = vrot.lane.b32.xlu2 %v442_v2, %s410_s5 }
  0x50   :  { %283 = vset.pattern.permute.xlu1 %v411_v12 }
  0x51   :  { %206 = vperm.xlu1 %283, %v64_v3  }
  0x52   :  { %225 = vperm.xlu2 %284, %v64_v3  }
  0x6a   :  { %v93_v13 = vpop.permute.xlu2 %92 }
  0x72   :  { %v100_v14 = vpop.permute.xlu2 %99 }
  0x7a   :  { %v112_v17 = vpop.permute.xlu2 %111 }
  0x81   :  { %v79_v15 = vpop.permute.xlu1 %78  ;;  %v68_v16 = vpop.permute.xlu0 %67 }
  0x82   :  { %v70_v40 = vmul.f32 %v68_v16, %v442_v2  ;;  %v71_v41 = vmul.f32 %v68_v16, %v445_v4  ;;  %v163_v2 = vperm.slane %v468_v31, 5 }
  0x83   :  { %v131_v21 = vpop.permute.xlu2 %130 }
  0x89   :  { %v81_v18 = vpop.permute.xlu1 %80 }
  0x8a   :  { %v74_v19 = vpop.permute.xlu0 %73  ;;  %v85_v37 = vsel %vm84_vm0, %v79_v15, %v81_v18  ;;  %v86_v38 = vsel %vm84_vm0, %v81_v18, %v79_v15  ;;  %v183_v15 = vperm.slane %v470_v32, 6 }
  0x8b   :  { %v89_v43 = vmul.f32 %v87_v35, %v86_v38  ;;  %v90_v44 = vmul.f32 %v88_v36, %v85_v37  ;;  %v76_v55 = vadd.f32 %v74_v19, %v70_v40  ;;  %v77_v56 = vadd.f32 %v74_v19, %v71_v41 }
  0x8c   :  { %v462_v25 = vpop.permute.xlu2 %149  ;;  %v201_v36 = vperm.slane %v468_v31, 7  ;;  %v202_v37 = vperm.slane %v470_v32, 7 }
  0x8d   :  { %v95_v60 = vmul.f32 %v93_v13, %v89_v43  ;;  %v96_v61 = vmul.f32 %v93_v13, %v90_v44  ;;  %v287_v43 = vld [vmem:[#allocation7 + $0x18] ss:$0 sm:$0xff] }
  0x8f   :  { %v97_v7 = vadd.f32 %v95_v60, %v76_v55  ;;  %v98_v8 = vadd.f32 %v96_v61, %v77_v56 }
  0x91   :  { %v102_v20 = vpop.permute.xlu1 %101 }
  0x92   :  { %v119_v22 = vpop.permute.xlu0 %118  ;;  %v104_v45 = vsel %vm103_vm1, %v100_v14, %v102_v20  ;;  %v105_v46 = vsel %vm103_vm1, %v102_v20, %v100_v14  ;;  %v182_v14 = vperm.slane %v468_v31, 6 }
  0x93   :  { %v108_v57 = vmul.f32 %v106_v39, %v105_v46  ;;  %v109_v58 = vmul.f32 %v107_v42, %v104_v45  ;;  %v286_v42 = vld [vmem:[#allocation7 + $0x10] ss:$0 sm:$0xff] }
  0x94   :  { %v466_v30 = vpop.permute.xlu2 %175 }
  0x95   :  { %v114_v3 = vmul.f32 %v112_v17, %v108_v57  ;;  %v115_v4 = vmul.f32 %v112_v17, %v109_v58 }
  0x97   :  { %v116_v18 = vadd.f32 %v114_v3, %v97_v7  ;;  %v117_v19 = vadd.f32 %v115_v4, %v98_v8 }
  0x99   :  { %v121_v23 = vpop.permute.xlu1 %120 }
  0x9a   :  { %v138_v24 = vpop.permute.xlu0 %137  ;;  %v123_v50 = vsel %vm122_vm2, %v119_v22, %v121_v23  ;;  %v124_v51 = vsel %vm122_vm2, %v121_v23, %v119_v22 }
  0x9b   :  { %v127_v0 = vmul.f32 %v125_v48, %v124_v51  ;;  %v128_v1 = vmul.f32 %v126_v49, %v123_v50 }
  0x9c   :  { %v481_v47 = vpop.permute.xlu2 %194 }
  0x9d   :  { %v133_v10 = vmul.f32 %v131_v21, %v127_v0  ;;  %v134_v11 = vmul.f32 %v131_v21, %v128_v1 }
  0xa1   :  { %v140_v27 = vpop.permute.xlu1 %139 }
  0xa2   :  { %v157_v28 = vpop.permute.xlu0 %156  ;;  %v142_v62 = vsel %vm141_vm3, %v138_v24, %v140_v27  ;;  %v143_v63 = vsel %vm141_vm3, %v140_v27, %v138_v24  ;;  %v135_v27 = vadd.f32 %v133_v10, %v116_v18 }
  0xa3   :  { %v146_v5 = vmul.f32 %v144_v52, %v143_v63  ;;  %v147_v6 = vmul.f32 %v145_v53, %v142_v62 }
  0xa4   :  { %v214_v16 = vpop.permute.xlu2 %213 }
  0xa5   :  { %v152_v17 = vmul.f32 %v462_v25, %v146_v5  ;;  %v153_v20 = vmul.f32 %v462_v25, %v147_v6 }
  0xa7   :  { %v154_v40 = vadd.f32 %v152_v17, %v135_v27 }
  0xa9   :  { %v159_v33 = vpop.permute.xlu1 %158 }
  0xaa   :  { %v178_v34 = vpop.permute.xlu0 %177  ;;  %v161_v12 = vsel %vm160_vm4, %v157_v28, %v159_v33  ;;  %v162_v13 = vsel %vm160_vm4, %v159_v33, %v157_v28  ;;  %v136_v28 = vadd.f32 %v134_v11, %v117_v19 }
  0xab   :  { %v165_v23 = vmul.f32 %v163_v2, %v161_v12  ;;  %v166_v24 = vmul.f32 %v164_v9, %v162_v13  ;;  %v180_v21 = vsel %vm179_vm5, %v466_v30, %v178_v34  ;;  %v181_v26 = vsel %vm179_vm5, %v178_v34, %v466_v30 }
  0xac   :  { %v184_v38 = vmul.f32 %v182_v14, %v180_v21  ;;  %v185_v39 = vmul.f32 %v183_v15, %v181_v26  ;;  %v155_v41 = vadd.f32 %v153_v20, %v136_v28  ;;  %v226_v52 = vpop.permute.xlu2 %225 }
  0xb1   :  { %v169_v54 = vpop.permute.xlu1 %168 }
  0xb2   :  { %v197_v59 = vpop.permute.xlu0 %196  ;;  %v171_v35 = vmul.f32 %v169_v54, %v165_v23  ;;  %v172_v25 = vmul.f32 %v169_v54, %v166_v24 }
  0xb3   :  { %v199_v30 = vsel %vm198_vm6, %v481_v47, %v197_v59  ;;  %v200_v34 = vsel %vm198_vm6, %v197_v59, %v481_v47 }
  0xb4   :  { %v173_v48 = vadd.f32 %v171_v35, %v154_v40  ;;  %v174_v49 = vadd.f32 %v172_v25, %v155_v41  ;;  %v203_v51 = vmul.f32 %v201_v36, %v199_v30  ;;  %v204_v32 = vmul.f32 %v202_v37, %v200_v34 }
  0xba   :  { %v188_v22 = vpop.permute.xlu1 %187  ;;  %v216_v33 = vpop.permute.xlu0 %215 }
  0xbb   :  { %v218_v44 = vsel %vm217_vm7, %v214_v16, %v216_v33  ;;  %v219_v45 = vsel %vm217_vm7, %v216_v33, %v214_v16  ;;  %v190_v29 = vmul.f32 %v188_v22, %v184_v38  ;;  %v191_v46 = vmul.f32 %v188_v22, %v185_v39 }
  0xbc   :  { %v222_v50 = vmul.f32 %v286_v42, %v218_v44  ;;  %v223_v31 = vmul.f32 %v287_v43, %v219_v45 }
  0xbd   :  { %v192_v54 = vadd.f32 %v190_v29, %v173_v48  ;;  %v193_v55 = vadd.f32 %v191_v46, %v174_v49 }
  0xbe   :  { %v228_v58 = vmul.f32 %v226_v52, %v222_v50  ;;  %v229_v60 = vmul.f32 %v226_v52, %v223_v31 }
  0xc3   :  { %v207_v53 = vpop.permute.xlu1 %206 }
  0xc4   :  { %v209_v56 = vmul.f32 %v207_v53, %v203_v51  ;;  %v210_v57 = vmul.f32 %v207_v53, %v204_v32 }
  0xc6   :  { %v211_v61 = vadd.f32 %v209_v56, %v192_v54  ;;  %v212_v47 = vadd.f32 %v210_v57, %v193_v55 }
  0xc8   :  { %v230_v59 = vadd.f32 %v228_v58, %v211_v61  ;;  %v231_v62 = vadd.f32 %v229_v60, %v212_v47 }
  0xca   :  { %232 = vst [vmem:[#allocation8] sm:$0xff] %v230_v59 }
  0xcb   :  { %233 = vst [vmem:[#allocation8 + $0x8] sm:$0xff] %v231_v62 }
  0xcc   :  { %244 = dma.vmem_to_hbm [thread:$0]  %s240_s7, 256, %s242_s10, [#allocation4]  }
  0xcd   :  { %388 = dma.done.wait [#allocation4], 256  }
  0xce   :  { %389 = vsyncadd [#allocation4], 4294967040 }
  0xcf   :  { %249 = vsyncpa [#allocation3], 1 }
  0xd0   :  { %250 = vsyncpa [#allocation6], 1 }
  0xd1   :  { %251 = vsyncpa [#allocation4], 1 }

</bundles_post_ra>
